<compile_context>
chip_gen: v6e
topology: v6e:2x2x1
jax: 0.10.0
libtpu: 0.0.40
codegen_flags: <defaults>
</compile_context>

<pallas_src>
import jax
import jax.numpy as jnp
from jax.experimental import pallas as pl
from jax.experimental.pallas import tpu as pltpu

HIDDEN = 10
LANES = 128


def _round_up(n, m):
    return ((n + m - 1) // m) * m


def _mlp_kernel(params_ref, x_ref, o_ref):
    # params_ref: SMEM (3*HIDDEN+1,) f32 = [w1(10) | b1(10) | w2(10) | b2(1)].
    # x_ref / o_ref: (tile_rows, 128) dense batch tiles (batch on sublanes AND lanes).
    x = x_ref[...].astype(jnp.float32)
    acc = jnp.full(x.shape, params_ref[3 * HIDDEN], dtype=jnp.float32)   # start at b2
    for j in range(HIDDEN):                                              # unrolled, scalar params
        h = jnp.maximum(params_ref[j] * x + params_ref[HIDDEN + j], 0.0)
        acc = acc + params_ref[2 * HIDDEN + j] * h
    o_ref[...] = acc.astype(o_ref.dtype)


def _mlp_pallas(x_slab, params, tile_rows):
    rows = x_slab.shape[0]
    grid = (rows // tile_rows,)   # tile_rows always divides rows by construction
    return pl.pallas_call(
        _mlp_kernel,
        out_shape=jax.ShapeDtypeStruct(x_slab.shape, x_slab.dtype),
        grid=grid,
        in_specs=[
            pl.BlockSpec(memory_space=pltpu.MemorySpace.SMEM),        # flat params
            pl.BlockSpec((tile_rows, LANES), lambda i: (i, 0)),       # x tile
        ],
        out_specs=pl.BlockSpec((tile_rows, LANES), lambda i: (i, 0)),
        compiler_params=pltpu.CompilerParams(
            dimension_semantics=("parallel",)),
    )(params, x_slab)


def mlp_forward(x, w1, b1, w2, b2, *, max_tile_rows=2048,
                min_pallas_batch=1 << 16, force_pallas=False):
    """x: (B, 1); w1: (10, 1); b1: (10,); w2: (1, 10); b2: (1,). Returns (B, 1)."""
    B = x.shape[0]

    # Tiny batches: launch/overhead bound — let XLA fuse the ~180 FLOPs.
    if B < min_pallas_batch and not force_pallas:
        return jnp.maximum(x @ w1.T + b1, 0.0) @ w2.T + b2

    # --- layout plumbing (free reshapes on the aligned hot path) ---
    flat = x.reshape(-1)                            # (B,), bitcast
    b_lane = _round_up(B, LANES)
    rows = b_lane // LANES

    # Tile selection: big tiles (amortize per-step overhead), multiple of 8
    # sublanes, >= 2 grid steps when feasible (v7x megacore), and conservative
    # VMEM (<= ~4 MiB double-buffered in+out, safe on v5e/v6e/v7x defaults).
    if rows <= 16:
        tile_rows = rows                            # full-extent block (grid = 1)
    else:
        tile_rows = min(max_tile_rows, _round_up((rows + 1) // 2, 8))

    rows_pad = _round_up(rows, tile_rows)
    n_pad = rows_pad * LANES - B
    if n_pad:                                       # ragged tail only
        flat = jnp.pad(flat, (0, n_pad))
    x_slab = flat.reshape(rows_pad, LANES)          # batch on sublanes AND lanes

    params = jnp.concatenate(
        [w1.reshape(-1), b1.reshape(-1), w2.reshape(-1), b2.reshape(-1)]
    ).astype(jnp.float32)                           # (31,) -> SMEM

    out_slab = _mlp_pallas(x_slab, params, tile_rows)

    out_flat = out_slab.reshape(-1)
    if n_pad:
        out_flat = out_flat[:B]
    return out_flat.reshape(B, 1)


def init_params(key):
    # Deterministic init matching nn.Linear's U(-1/sqrt(fan_in), 1/sqrt(fan_in)).
    k1, k2, k3, k4 = jax.random.split(key, 4)
    bound1 = 1.0 / jnp.sqrt(1.0)     # fc1: in_features = 1
    bound2 = 1.0 / jnp.sqrt(10.0)    # fc2: in_features = 10
    w1 = jax.random.uniform(k1, (HIDDEN, 1), jnp.float32, -bound1, bound1)
    b1 = jax.random.uniform(k2, (HIDDEN,), jnp.float32, -bound1, bound1)
    w2 = jax.random.uniform(k3, (1, HIDDEN), jnp.float32, -bound2, bound2)
    b2 = jax.random.uniform(k4, (1,), jnp.float32, -bound2, bound2)
    return w1, b1, w2, b2


if __name__ == "__main__":
    key = jax.random.PRNGKey(0)
    pkey, k_small, k_ragged, k_big = jax.random.split(key, 4)
    w1, b1, w2, b2 = init_params(pkey)

    def ref(xv):
        return jnp.maximum(xv @ w1.T + b1, 0.0) @ w2.T + b2

    # 1) Small shape consistent with the module (batch=8, in_features=1),
    #    forced through the Pallas kernel.
    x_small = jax.random.normal(k_small, (8, 1), jnp.float32)
    out_small = mlp_forward(x_small, w1, b1, w2, b2, force_pallas=True)
    jax.block_until_ready(out_small)
    assert out_small.shape == (8, 1)
    assert jnp.allclose(out_small, ref(x_small), atol=1e-5, rtol=1e-5)

    # 2) Ragged batch (minimal pad + un-slice path), still through Pallas.
    x_rag = jax.random.normal(k_ragged, (300, 1), jnp.float32)
    out_rag = mlp_forward(x_rag, w1, b1, w2, b2, force_pallas=True)
    jax.block_until_ready(out_rag)
    assert out_rag.shape == (300, 1)
    assert jnp.allclose(out_rag, ref(x_rag), atol=1e-5, rtol=1e-5)

    # 3) Large aligned batch exercising the hot path: 256K rows -> (2048, 128)
    #    slab, two (1024, 128) dense tiles, no pad / no slice, grid split
    #    across TensorCores via dimension_semantics=("parallel",).
    B_big = 256 * 1024
    x_big = jax.random.normal(k_big, (B_big, 1), jnp.float32)
    out_big = mlp_forward(x_big, w1, b1, w2, b2)
    jax.block_until_ready(out_big)
    assert out_big.shape == (B_big, 1)
    assert jnp.allclose(out_big, ref(x_big), atol=1e-5, rtol=1e-5)

    print("KERNEL_OK")
</pallas_src>

<mosaic_0001>
module attributes {stable_mosaic.version = 11 : i64} {
  func.func @_mlp_kernel(%arg0: i32, %arg1: memref<31xf32, #tpu.memory_space<smem>>, %arg2: memref<1x128xf32, #tpu.memory_space<vmem>>, %arg3: memref<1x128xf32, #tpu.memory_space<vmem>>) attributes {dimension_semantics = [#tpu.dimension_semantics<parallel>], iteration_bounds = array<i64: 1>, scalar_prefetch = 0 : i64, scratch_operands = 0 : i64, tpu.core_type = #tpu.core_type<tc>, window_params = [{transform_indices = @transform_0, window_bounds = array<i64: 31>}, {transform_indices = @transform_1, window_bounds = array<i64: 1, 128>}, {transform_indices = @transform_2, window_bounds = array<i64: 1, 128>}]} {
    %c0 = arith.constant 0 : index
    %c0_0 = arith.constant 0 : index
    %0 = vector.load %arg2[%c0, %c0_0] : memref<1x128xf32, #tpu.memory_space<vmem>>, vector<1x128xf32>
    %c30 = arith.constant 30 : index
    %1 = memref.load %arg1[%c30] : memref<31xf32, #tpu.memory_space<smem>>
    %2 = vector.broadcast %1 : f32 to vector<1x128xf32>
    %c0_1 = arith.constant 0 : index
    %3 = memref.load %arg1[%c0_1] : memref<31xf32, #tpu.memory_space<smem>>
    %4 = vector.broadcast %3 : f32 to vector<1x128xf32>
    %5 = arith.mulf %4, %0 : vector<1x128xf32>
    %c10 = arith.constant 10 : index
    %6 = memref.load %arg1[%c10] : memref<31xf32, #tpu.memory_space<smem>>
    %7 = vector.broadcast %6 : f32 to vector<1x128xf32>
    %8 = arith.addf %5, %7 : vector<1x128xf32>
    %cst = arith.constant 0.000000e+00 : f32
    %9 = vector.broadcast %cst : f32 to vector<1x128xf32>
    %10 = arith.maximumf %8, %9 : vector<1x128xf32>
    %c20 = arith.constant 20 : index
    %11 = memref.load %arg1[%c20] : memref<31xf32, #tpu.memory_space<smem>>
    %12 = vector.broadcast %11 : f32 to vector<1x128xf32>
    %13 = arith.mulf %12, %10 : vector<1x128xf32>
    %14 = arith.addf %2, %13 : vector<1x128xf32>
    %c1 = arith.constant 1 : index
    %15 = memref.load %arg1[%c1] : memref<31xf32, #tpu.memory_space<smem>>
    %16 = vector.broadcast %15 : f32 to vector<1x128xf32>
    %17 = arith.mulf %16, %0 : vector<1x128xf32>
    %c11 = arith.constant 11 : index
    %18 = memref.load %arg1[%c11] : memref<31xf32, #tpu.memory_space<smem>>
    %19 = vector.broadcast %18 : f32 to vector<1x128xf32>
    %20 = arith.addf %17, %19 : vector<1x128xf32>
    %cst_2 = arith.constant 0.000000e+00 : f32
    %21 = vector.broadcast %cst_2 : f32 to vector<1x128xf32>
    %22 = arith.maximumf %20, %21 : vector<1x128xf32>
    %c21 = arith.constant 21 : index
    %23 = memref.load %arg1[%c21] : memref<31xf32, #tpu.memory_space<smem>>
    %24 = vector.broadcast %23 : f32 to vector<1x128xf32>
    %25 = arith.mulf %24, %22 : vector<1x128xf32>
    %26 = arith.addf %14, %25 : vector<1x128xf32>
    %c2 = arith.constant 2 : index
    %27 = memref.load %arg1[%c2] : memref<31xf32, #tpu.memory_space<smem>>
    %28 = vector.broadcast %27 : f32 to vector<1x128xf32>
    %29 = arith.mulf %28, %0 : vector<1x128xf32>
    %c12 = arith.constant 12 : index
    %30 = memref.load %arg1[%c12] : memref<31xf32, #tpu.memory_space<smem>>
    %31 = vector.broadcast %30 : f32 to vector<1x128xf32>
    %32 = arith.addf %29, %31 : vector<1x128xf32>
    %cst_3 = arith.constant 0.000000e+00 : f32
    %33 = vector.broadcast %cst_3 : f32 to vector<1x128xf32>
    %34 = arith.maximumf %32, %33 : vector<1x128xf32>
    %c22 = arith.constant 22 : index
    %35 = memref.load %arg1[%c22] : memref<31xf32, #tpu.memory_space<smem>>
    %36 = vector.broadcast %35 : f32 to vector<1x128xf32>
    %37 = arith.mulf %36, %34 : vector<1x128xf32>
    %38 = arith.addf %26, %37 : vector<1x128xf32>
    %c3 = arith.constant 3 : index
    %39 = memref.load %arg1[%c3] : memref<31xf32, #tpu.memory_space<smem>>
    %40 = vector.broadcast %39 : f32 to vector<1x128xf32>
    %41 = arith.mulf %40, %0 : vector<1x128xf32>
    %c13 = arith.constant 13 : index
    %42 = memref.load %arg1[%c13] : memref<31xf32, #tpu.memory_space<smem>>
    %43 = vector.broadcast %42 : f32 to vector<1x128xf32>
    %44 = arith.addf %41, %43 : vector<1x128xf32>
    %cst_4 = arith.constant 0.000000e+00 : f32
    %45 = vector.broadcast %cst_4 : f32 to vector<1x128xf32>
    %46 = arith.maximumf %44, %45 : vector<1x128xf32>
    %c23 = arith.constant 23 : index
    %47 = memref.load %arg1[%c23] : memref<31xf32, #tpu.memory_space<smem>>
    %48 = vector.broadcast %47 : f32 to vector<1x128xf32>
    %49 = arith.mulf %48, %46 : vector<1x128xf32>
    %50 = arith.addf %38, %49 : vector<1x128xf32>
    %c4 = arith.constant 4 : index
    %51 = memref.load %arg1[%c4] : memref<31xf32, #tpu.memory_space<smem>>
    %52 = vector.broadcast %51 : f32 to vector<1x128xf32>
    %53 = arith.mulf %52, %0 : vector<1x128xf32>
    %c14 = arith.constant 14 : index
    %54 = memref.load %arg1[%c14] : memref<31xf32, #tpu.memory_space<smem>>
    %55 = vector.broadcast %54 : f32 to vector<1x128xf32>
    %56 = arith.addf %53, %55 : vector<1x128xf32>
    %cst_5 = arith.constant 0.000000e+00 : f32
    %57 = vector.broadcast %cst_5 : f32 to vector<1x128xf32>
    %58 = arith.maximumf %56, %57 : vector<1x128xf32>
    %c24 = arith.constant 24 : index
    %59 = memref.load %arg1[%c24] : memref<31xf32, #tpu.memory_space<smem>>
    %60 = vector.broadcast %59 : f32 to vector<1x128xf32>
    %61 = arith.mulf %60, %58 : vector<1x128xf32>
    %62 = arith.addf %50, %61 : vector<1x128xf32>
    %c5 = arith.constant 5 : index
    %63 = memref.load %arg1[%c5] : memref<31xf32, #tpu.memory_space<smem>>
    %64 = vector.broadcast %63 : f32 to vector<1x128xf32>
    %65 = arith.mulf %64, %0 : vector<1x128xf32>
    %c15 = arith.constant 15 : index
    %66 = memref.load %arg1[%c15] : memref<31xf32, #tpu.memory_space<smem>>
    %67 = vector.broadcast %66 : f32 to vector<1x128xf32>
    %68 = arith.addf %65, %67 : vector<1x128xf32>
    %cst_6 = arith.constant 0.000000e+00 : f32
    %69 = vector.broadcast %cst_6 : f32 to vector<1x128xf32>
    %70 = arith.maximumf %68, %69 : vector<1x128xf32>
    %c25 = arith.constant 25 : index
    %71 = memref.load %arg1[%c25] : memref<31xf32, #tpu.memory_space<smem>>
    %72 = vector.broadcast %71 : f32 to vector<1x128xf32>
    %73 = arith.mulf %72, %70 : vector<1x128xf32>
    %74 = arith.addf %62, %73 : vector<1x128xf32>
    %c6 = arith.constant 6 : index
    %75 = memref.load %arg1[%c6] : memref<31xf32, #tpu.memory_space<smem>>
    %76 = vector.broadcast %75 : f32 to vector<1x128xf32>
    %77 = arith.mulf %76, %0 : vector<1x128xf32>
    %c16 = arith.constant 16 : index
    %78 = memref.load %arg1[%c16] : memref<31xf32, #tpu.memory_space<smem>>
    %79 = vector.broadcast %78 : f32 to vector<1x128xf32>
    %80 = arith.addf %77, %79 : vector<1x128xf32>
    %cst_7 = arith.constant 0.000000e+00 : f32
    %81 = vector.broadcast %cst_7 : f32 to vector<1x128xf32>
    %82 = arith.maximumf %80, %81 : vector<1x128xf32>
    %c26 = arith.constant 26 : index
    %83 = memref.load %arg1[%c26] : memref<31xf32, #tpu.memory_space<smem>>
    %84 = vector.broadcast %83 : f32 to vector<1x128xf32>
    %85 = arith.mulf %84, %82 : vector<1x128xf32>
    %86 = arith.addf %74, %85 : vector<1x128xf32>
    %c7 = arith.constant 7 : index
    %87 = memref.load %arg1[%c7] : memref<31xf32, #tpu.memory_space<smem>>
    %88 = vector.broadcast %87 : f32 to vector<1x128xf32>
    %89 = arith.mulf %88, %0 : vector<1x128xf32>
    %c17 = arith.constant 17 : index
    %90 = memref.load %arg1[%c17] : memref<31xf32, #tpu.memory_space<smem>>
    %91 = vector.broadcast %90 : f32 to vector<1x128xf32>
    %92 = arith.addf %89, %91 : vector<1x128xf32>
    %cst_8 = arith.constant 0.000000e+00 : f32
    %93 = vector.broadcast %cst_8 : f32 to vector<1x128xf32>
    %94 = arith.maximumf %92, %93 : vector<1x128xf32>
    %c27 = arith.constant 27 : index
    %95 = memref.load %arg1[%c27] : memref<31xf32, #tpu.memory_space<smem>>
    %96 = vector.broadcast %95 : f32 to vector<1x128xf32>
    %97 = arith.mulf %96, %94 : vector<1x128xf32>
    %98 = arith.addf %86, %97 : vector<1x128xf32>
    %c8 = arith.constant 8 : index
    %99 = memref.load %arg1[%c8] : memref<31xf32, #tpu.memory_space<smem>>
    %100 = vector.broadcast %99 : f32 to vector<1x128xf32>
    %101 = arith.mulf %100, %0 : vector<1x128xf32>
    %c18 = arith.constant 18 : index
    %102 = memref.load %arg1[%c18] : memref<31xf32, #tpu.memory_space<smem>>
    %103 = vector.broadcast %102 : f32 to vector<1x128xf32>
    %104 = arith.addf %101, %103 : vector<1x128xf32>
    %cst_9 = arith.constant 0.000000e+00 : f32
    %105 = vector.broadcast %cst_9 : f32 to vector<1x128xf32>
    %106 = arith.maximumf %104, %105 : vector<1x128xf32>
    %c28 = arith.constant 28 : index
    %107 = memref.load %arg1[%c28] : memref<31xf32, #tpu.memory_space<smem>>
    %108 = vector.broadcast %107 : f32 to vector<1x128xf32>
    %109 = arith.mulf %108, %106 : vector<1x128xf32>
    %110 = arith.addf %98, %109 : vector<1x128xf32>
    %c9 = arith.constant 9 : index
    %111 = memref.load %arg1[%c9] : memref<31xf32, #tpu.memory_space<smem>>
    %112 = vector.broadcast %111 : f32 to vector<1x128xf32>
    %113 = arith.mulf %112, %0 : vector<1x128xf32>
    %c19 = arith.constant 19 : index
    %114 = memref.load %arg1[%c19] : memref<31xf32, #tpu.memory_space<smem>>
    %115 = vector.broadcast %114 : f32 to vector<1x128xf32>
    %116 = arith.addf %113, %115 : vector<1x128xf32>
    %cst_10 = arith.constant 0.000000e+00 : f32
    %117 = vector.broadcast %cst_10 : f32 to vector<1x128xf32>
    %118 = arith.maximumf %116, %117 : vector<1x128xf32>
    %c29 = arith.constant 29 : index
    %119 = memref.load %arg1[%c29] : memref<31xf32, #tpu.memory_space<smem>>
    %120 = vector.broadcast %119 : f32 to vector<1x128xf32>
    %121 = arith.mulf %120, %118 : vector<1x128xf32>
    %122 = arith.addf %110, %121 : vector<1x128xf32>
    %c0_11 = arith.constant 0 : index
    %c0_12 = arith.constant 0 : index
    %123 = vector.load %arg3[%c0_11, %c0_12] : memref<1x128xf32, #tpu.memory_space<vmem>>, vector<1x128xf32>
    tpu.vector_store %arg3[%c0_11, %c0_12], %122 {strides = array<i32>} : memref<1x128xf32, #tpu.memory_space<vmem>>, vector<1x128xf32>,
    return
  }
  func.func @transform_0(%arg0: i32) -> i32 {
    %c0_i32 = arith.constant 0 : i32
    %c0_i32_0 = arith.constant 0 : i32
    return %c0_i32 : i32
  }
  func.func @transform_1(%arg0: i32) -> (i32, i32) {
    %c0_i32 = arith.constant 0 : i32
    %c0_i32_0 = arith.constant 0 : i32
    return %arg0, %c0_i32 : i32, i32
  }
  func.func @transform_2(%arg0: i32) -> (i32, i32) {
    %c0_i32 = arith.constant 0 : i32
    %c0_i32_0 = arith.constant 0 : i32
    return %arg0, %c0_i32 : i32, i32
  }
}

</mosaic_0001>

<bundles_post_ra>
// kernel: tpu_custom_call.1
= control target key start
LH: loop header
LB: loop body
LE: loop exit
PB: predicated region body
PF: predicated region fallthrough
CT: control target
= control target key end

     0   :  { %7 = vsyncpa [#allocation4], 0  ;;  %s278_s0 = inlined_call_operand.hbm [shape: f32[31], index: 0, kind: input, shape index: {}]   ;;  %s279_s1 = inlined_call_operand.vmem [shape: f32[1,128], index: 1, kind: input, shape index: {}]   ;;  %s280_s2 = inlined_call_operand.hbm [shape: f32[1,128], index: 2, kind: output, shape index: {}]  }
   0x1   :  { %8 = vsyncpa [#allocation3], 0  ;;  %s216_s9 = smov [#allocation2]  }
   0x2   :  { %16 = dma.hbm_to_smem %s278_s0, 16, %s216_s9, [#allocation4]  }
   0x3   :  { %212 = dma.done.wait [#allocation4], 16  }
   0x4   :  { %213 = vsyncadd [#allocation4], 4294967280 }
   0x5   :  { %22 = sfence }
   0x6   :  { %s236_s12 = sld [smem:[#allocation2 + $0x1e]]  ;;  %v241_v0 = vld [vmem:[%s279_s1] sm:$0x1] }
   0x7   :  { %s26_s13 = sld [smem:[#allocation2]] }
   0x8   :  { %s153_s14 = sld [smem:[#allocation2 + $0xa]] }
   0x9   :  { %s154_s15 = sld [smem:[#allocation2 + $0x14]] }
   0xa   :  { %s155_s16 = sld [smem:[#allocation2 + $0x1]] }
   0xb   :  { %s156_s19 = sld [smem:[#allocation2 + $0xb]] }
   0xc   :  { %s243_s20 = sld [smem:[#allocation2 + $0x15]]  ;;  %v25_v10 = vstv %s236_s12 }
   0xd   :  { %v27_v1 = vstv %s26_s13  ;;  %s158_s0 = sld [smem:[#allocation2 + $0x2]] }
   0xe   :  { %v28_v2 = vmul.f32 %v27_v1, %v241_v0  ;;  %v30_v3 = vstv %s153_s14  ;;  %s159_s21 = sld [smem:[#allocation2 + $0xc]] }
   0xf   :  { %s246_s22 = sld [smem:[#allocation2 + $0x16]]  ;;  %v34_v6 = vstv %s154_s15  ;;  %s217_s15 = smov [#allocation5]  }
  0x10   :  { %v31_v4 = vadd.f32 %v30_v3, %v28_v2  ;;  %v38_v5 = vstv %s155_s16  ;;  %s161_s23 = sld [smem:[#allocation2 + $0x3]]  ;;  %s143_s16 = sshll.u32 %s217_s15, 4  ;;  %s144_s16 = int_to_ptr.vmem [resolvable:$true] %s143_s16 }
  0x11   :  { %v39_v7 = vmul.f32 %v38_v5, %v241_v0  ;;  %v41_v8 = vstv %s156_s19  ;;  %s162_s1 = sld [smem:[#allocation2 + $0xd]]  ;;  %s192_s17 = scalar_lea.vmem %s144_s16, 16 }
  0x12   :  { %v32_v9 = vmax.f32 %v31_v4, 0.0  ;;  %s249_s24 = sld [smem:[#allocation2 + $0x17]]  ;;  %v45_v14 = vstv %s243_s20  ;;  %p193_p0 = scmp.ne.s32.totalorder %s144_s16, %s192_s17 }
  0x13   :  { %v42_v11 = vadd.f32 %v41_v8, %v39_v7  ;;  %v49_v12 = vstv %s158_s0  ;;  %s164_s25 = sld [smem:[#allocation2 + $0x4]]  ;;  %s196_s18 = scalar_lea.vmem %s144_s16, 32 }
  0x14   :  { %v35_v13 = vmul.f32 %v34_v6, %v32_v9  ;;  %v50_v15 = vmul.f32 %v49_v12, %v241_v0  ;;  %v52_v16 = vstv %s159_s21  ;;  %s165_s26 = sld [smem:[#allocation2 + $0xe]]  ;;  %p197_p1 = scmp.lt.s32.totalorder %s144_s16, %s144_s16 }
  0x15   :  { %v43_v17 = vmax.f32 %v42_v11, 0.0  ;;  %s254_s27 = sld [smem:[#allocation2 + $0x18]]  ;;  %v56_v22 = vstv %s246_s22  ;;  %p198_p2 = scmp.lt.s32.totalorder %s196_s18, %s192_s17 }
  0x16   :  { %v36_v18 = vadd.f32 %v35_v13, %v25_v10  ;;  %v53_v19 = vadd.f32 %v52_v16, %v50_v15  ;;  %v60_v20 = vstv %s161_s23  ;;  %s167_s28 = sld [smem:[#allocation2 + $0x5]] }
  0x17   :  { %v46_v21 = vmul.f32 %v45_v14, %v43_v17  ;;  %v61_v23 = vmul.f32 %v60_v20, %v241_v0  ;;  %v63_v24 = vstv %s162_s1  ;;  %s168_s29 = sld [smem:[#allocation2 + $0xf]]  ;;  %p199_p3 = por %p198_p2, %p197_p1 }
  0x18   :  { %v54_v25 = vmax.f32 %v53_v19, 0.0  ;;  %s258_s30 = sld [smem:[#allocation2 + $0x19]]  ;;  %v67_v30 = vstv %s249_s24 }
  0x19   :  { %v47_v26 = vadd.f32 %v46_v21, %v36_v18  ;;  %v64_v27 = vadd.f32 %v63_v24, %v61_v23  ;;  %v71_v28 = vstv %s164_s25  ;;  %s170_s3 = sld [smem:[#allocation2 + $0x6]]  ;;  %p200_p4 = pnand %p199_p3, %p193_p0 }
  0x1a   :  { %v57_v29 = vmul.f32 %v56_v22, %v54_v25  ;;  %v72_v31 = vmul.f32 %v71_v28, %v241_v0  ;;  %v74_v32 = vstv %s165_s26  ;;  %s171_s4 = sld [smem:[#allocation2 + $0x10]] }
  0x1b   :  { %v65_v33 = vmax.f32 %v64_v27, 0.0  ;;  %s262_s5 = sld [smem:[#allocation2 + $0x1a]]  ;;  %v78_v38 = vstv %s254_s27 }
  0x1c   :  { %v58_v34 = vadd.f32 %v57_v29, %v47_v26  ;;  %v75_v35 = vadd.f32 %v74_v32, %v72_v31  ;;  %v82_v36 = vstv %s167_s28  ;;  %s173_s6 = sld [smem:[#allocation2 + $0x7]] }
  0x1d   :  { %v68_v37 = vmul.f32 %v67_v30, %v65_v33  ;;  %v83_v39 = vmul.f32 %v82_v36, %v241_v0  ;;  %v85_v40 = vstv %s168_s29  ;;  %s174_s7 = sld [smem:[#allocation2 + $0x11]] }
  0x1e   :  { %v76_v41 = vmax.f32 %v75_v35, 0.0  ;;  %s266_s8 = sld [smem:[#allocation2 + $0x1b]]  ;;  %v89_v46 = vstv %s258_s30 }
  0x1f   :  { %v69_v42 = vadd.f32 %v68_v37, %v58_v34  ;;  %v86_v43 = vadd.f32 %v85_v40, %v83_v39  ;;  %v93_v44 = vstv %s170_s3  ;;  %s176_s9 = sld [smem:[#allocation2 + $0x8]] }
  0x20   :  { %v79_v45 = vmul.f32 %v78_v38, %v76_v41  ;;  %v94_v47 = vmul.f32 %v93_v44, %v241_v0  ;;  %v96_v48 = vstv %s171_s4  ;;  %s177_s10 = sld [smem:[#allocation2 + $0x12]] }
  0x21   :  { %v87_v49 = vmax.f32 %v86_v43, 0.0  ;;  %s178_s11 = sld [smem:[#allocation2 + $0x1c]]  ;;  %v100_v54 = vstv %s262_s5 }
  0x22   :  { %v80_v50 = vadd.f32 %v79_v45, %v69_v42  ;;  %v97_v51 = vadd.f32 %v96_v48, %v94_v47  ;;  %v104_v52 = vstv %s173_s6  ;;  %s179_s12 = sld [smem:[#allocation2 + $0x9]] }
  0x23   :  { %v90_v53 = vmul.f32 %v89_v46, %v87_v49  ;;  %v105_v55 = vmul.f32 %v104_v52, %v241_v0  ;;  %v107_v56 = vstv %s174_s7  ;;  %s180_s13 = sld [smem:[#allocation2 + $0x13]] }
  0x24   :  { %v98_v57 = vmax.f32 %v97_v51, 0.0  ;;  %s181_s14 = sld [smem:[#allocation2 + $0x1d]]  ;;  %v111_v62 = vstv %s266_s8 }
  0x25   :  { %v91_v58 = vadd.f32 %v90_v53, %v80_v50  ;;  %v108_v59 = vadd.f32 %v107_v56, %v105_v55  ;;  %v115_v60 = vstv %s176_s9 }
  0x26   :  { %v101_v61 = vmul.f32 %v100_v54, %v98_v57  ;;  %v116_v63 = vmul.f32 %v115_v60, %v241_v0  ;;  %v118_v1 = vstv %s177_s10 }
  0x27   :  { %v109_v2 = vmax.f32 %v108_v59, 0.0  ;;  %v122_v7 = vstv %s178_s11 }
  0x28   :  { %v102_v3 = vadd.f32 %v101_v61, %v91_v58  ;;  %v119_v4 = vadd.f32 %v118_v1, %v116_v63  ;;  %v126_v5 = vstv %s179_s12 }
  0x29   :  { %v112_v6 = vmul.f32 %v111_v62, %v109_v2  ;;  %v127_v8 = vmul.f32 %v126_v5, %v241_v0  ;;  %v129_v9 = vstv %s180_s13 }
  0x2a   :  { %v120_v10 = vmax.f32 %v119_v4, 0.0  ;;  %v133_v14 = vstv %s181_s14 }
  0x2b   :  { %v113_v11 = vadd.f32 %v112_v6, %v102_v3  ;;  %v130_v12 = vadd.f32 %v129_v9, %v127_v8 }
  0x2c   :  { %v123_v13 = vmul.f32 %v122_v7, %v120_v10 }
  0x2d   :  { %v131_v15 = vmax.f32 %v130_v12, 0.0 }
  0x2e   :  { %v124_v16 = vadd.f32 %v123_v13, %v113_v11 }
  0x2f   :  { %v134_v17 = vmul.f32 %v133_v14, %v131_v15 }
  0x31   :  { %v135_v18 = vadd.f32 %v134_v17, %v124_v16 }
  0x33   :  { %136 = vst [vmem:[#allocation5] sm:$0x1] %v135_v18 }
  0x34   :  { %203 = shalt.err (!%p200_p4)
}
  0x35   :  { %146 = dma.vmem_to_hbm [thread:$0]  %s144_s16, 16, %s280_s2, [#allocation3]  }
  0x36   :  { %214 = dma.done.wait [#allocation3], 16  }
  0x37   :  { %215 = vsyncadd [#allocation3], 4294967280 }
  0x38   :  { %150 = vsyncpa [#allocation3], 1 }
  0x39   :  { %151 = vsyncpa [#allocation4], 1 }

</bundles_post_ra>
